<compile_context>
chip_gen: v6e
topology: v6e:2x2x1
jax: 0.10.0
libtpu: 0.0.40
codegen_flags: <defaults>
</compile_context>

<pallas_src>
import functools

import jax
import jax.numpy as jnp
from jax.experimental import pallas as pl
from jax.experimental.pallas import tpu as pltpu


# ---------------------------------------------------------------------------
# Fused kernel: SAGE layer 1 (ReLU) -> SAGE layer 2 -> node embeddings h2
# ---------------------------------------------------------------------------
def fused_double_sage_kernel(adj_ref, x_ref, ws1_ref, wn1_ref, b1_ref,
                             ws2_ref, wn2_ref, b2_ref, o_ref, *, R):
    # ---- layer 1: h1 = ReLU( x @ sum_r Wself_r + sum_r (A_r x) @ Wneigh_r + sum_r b_r ) --
    x = x_ref[...].astype(jnp.bfloat16)                               # (N, Din) bf16
    h1 = jnp.dot(x, ws1_ref[...], preferred_element_type=jnp.float32)  # (N, Dhid) fp32 acc
    for r in range(R):                                                # R static -> unrolled
        agg = jnp.dot(adj_ref[r], x, preferred_element_type=jnp.float32)
        h1 += jnp.dot(agg.astype(jnp.bfloat16), wn1_ref[r],
                      preferred_element_type=jnp.float32)
    h1 = jnp.maximum(h1 + b1_ref[...], 0.0)                           # fp32 elementwise

    # ---- layer 2 (no ReLU) ----
    h1b = h1.astype(jnp.bfloat16)                                     # (N, Dhid) bf16
    h2 = jnp.dot(h1b, ws2_ref[...], preferred_element_type=jnp.float32)
    for r in range(R):
        agg2 = jnp.dot(adj_ref[r], h1b, preferred_element_type=jnp.float32)
        h2 += jnp.dot(agg2.astype(jnp.bfloat16), wn2_ref[r],
                      preferred_element_type=jnp.float32)

    o_ref[...] = h2 + b2_ref[...]                                     # (N, Dout) fp32


# ---------------------------------------------------------------------------
# One-time weight packing (NOT in the per-forward path)
# ---------------------------------------------------------------------------
def pack_params(params):
    bf = lambda a: a.astype(jnp.bfloat16)
    return {
        "ws1": bf(jnp.sum(params["ws1"], axis=0)),   # (Din, Dhid)   sum_r Wself_r
        "wn1": bf(params["wn1"]),                    # (R, Din, Dhid)
        "b1":  jnp.sum(params["b1"], axis=0),        # (1, Dhid)     fp32
        "ws2": bf(jnp.sum(params["ws2"], axis=0)),   # (Dhid, Dout)
        "wn2": bf(params["wn2"]),                    # (R, Dhid, Dout)
        "b2":  jnp.sum(params["b2"], axis=0),        # (1, Dout)     fp32
        "pw1": params["pw1"][0],                     # (Dout,)  first half of Linear(2*Dout,1).W
        "pw2": params["pw2"][0],                     # (Dout,)  second half
        "pb":  params["pb"][0, 0],                   # ()
    }


def fused_double_sage(adj_bf16, x, p, *, R):
    N, Din = x.shape
    Dhid = p["ws1"].shape[1]
    Dout = p["ws2"].shape[1]

    flops = 2 * (R * N * N * Din + (R + 1) * N * Din * Dhid
                 + R * N * N * Dhid + (R + 1) * N * Dhid * Dout)
    bytes_accessed = (adj_bf16.size * 2 + x.size * 4
                      + 2 * (p["ws1"].size + p["wn1"].size + p["ws2"].size + p["wn2"].size)
                      + 4 * (p["b1"].size + p["b2"].size) + 4 * N * Dout)

    kernel = functools.partial(fused_double_sage_kernel, R=R)
    vmem = pl.BlockSpec(memory_space=pltpu.MemorySpace.VMEM)
    return pl.pallas_call(
        kernel,
        out_shape=jax.ShapeDtypeStruct((N, Dout), jnp.float32),
        in_specs=[vmem] * 8,
        out_specs=vmem,
        cost_estimate=pl.CostEstimate(flops=flops, transcendentals=0,
                                      bytes_accessed=bytes_accessed),
        compiler_params=pltpu.CompilerParams(vmem_limit_bytes=32 << 20),
    )(adj_bf16, x, p["ws1"], p["wn1"], p["b1"], p["ws2"], p["wn2"], p["b2"])


# ---------------------------------------------------------------------------
# DoubleSAGE forward
# ---------------------------------------------------------------------------
@functools.partial(jax.jit, static_argnames=("R",))
def double_sage_forward(packed, adj, x, pos_edges, neg_edges, *, R):
    adj_bf16 = adj.astype(jnp.bfloat16)                  # cast once, half the DMA bytes
    h2 = fused_double_sage(adj_bf16, x, packed, R=R)     # (N, Dout) node embeddings

    # MLP edge predictor: score(u,v) = <h_u, w1> + <h_v, w2> + b  (tiny, data-dependent
    # gather -> plain JAX glue; keeps the Pallas output lane-dense)
    proj_src = h2 @ packed["pw1"]                        # (N,)
    proj_dst = h2 @ packed["pw2"]                        # (N,)

    def score(edges):
        src, dst = edges
        return proj_src[src] + proj_dst[dst] + packed["pb"]

    return score(pos_edges), score(neg_edges)


# ---------------------------------------------------------------------------
# Deterministic setup
# ---------------------------------------------------------------------------
def make_params(key, R, in_feat=512, hid_feat=256, out_feat=64):
    ks = jax.random.split(key, 9)
    s = lambda k, shape, fan_in: (jax.random.normal(k, shape, jnp.float32)
                                  * (1.0 / jnp.sqrt(fan_in)))
    return {
        "ws1": s(ks[0], (R, in_feat, hid_feat), in_feat),
        "wn1": s(ks[1], (R, in_feat, hid_feat), in_feat),
        "b1":  jnp.zeros((R, 1, hid_feat), jnp.float32),
        "ws2": s(ks[2], (R, hid_feat, out_feat), hid_feat),
        "wn2": s(ks[3], (R, hid_feat, out_feat), hid_feat),
        "b2":  jnp.zeros((R, 1, out_feat), jnp.float32),
        "pw1": s(ks[4], (1, out_feat), 2 * out_feat),    # first half of Linear(128,1).W
        "pw2": s(ks[5], (1, out_feat), 2 * out_feat),    # second half
        "pb":  jnp.zeros((1, 1), jnp.float32),
    }


def make_graph(key, R, N):
    k_adj, k_ps, k_pd, k_ns, k_nd = jax.random.split(key, 5)
    mask = (jax.random.uniform(k_adj, (R, N, N)) < 0.3).astype(jnp.float32)
    deg = jnp.sum(mask, axis=-1, keepdims=True)
    adj = mask / jnp.maximum(deg, 1.0)                   # row-normalized => mean agg
    E = 8
    pos = (jax.random.randint(k_ps, (E,), 0, N), jax.random.randint(k_pd, (E,), 0, N))
    neg = (jax.random.randint(k_ns, (E,), 0, N), jax.random.randint(k_nd, (E,), 0, N))
    return adj, pos, neg


if __name__ == "__main__":
    key = jax.random.PRNGKey(0)
    k_param, k_graph, k_x = jax.random.split(key, 3)

    R, N, IN_FEAT = 2, 16, 512                           # 2 relation types, 16 nodes
    params = make_params(k_param, R, in_feat=IN_FEAT)
    packed = jax.block_until_ready(pack_params(params))  # one-time weight packing
    adj, pos_edges, neg_edges = make_graph(k_graph, R, N)
    x = jax.random.normal(k_x, (N, IN_FEAT), jnp.float32)

    pos_score, neg_score = double_sage_forward(packed, adj, x, pos_edges, neg_edges, R=R)
    jax.block_until_ready((pos_score, neg_score))

    assert pos_score.shape == (8,) and neg_score.shape == (8,)
    assert jnp.all(jnp.isfinite(pos_score)) and jnp.all(jnp.isfinite(neg_score))
    print("KERNEL_OK")
</pallas_src>

<mosaic_0001>
module attributes {stable_mosaic.version = 11 : i64} {
  func.func @fused_double_sage_kernel(%arg0: memref<2x16x16xbf16, #tpu.memory_space<vmem>>, %arg1: memref<16x512xf32, #tpu.memory_space<vmem>>, %arg2: memref<512x256xbf16, #tpu.memory_space<vmem>>, %arg3: memref<2x512x256xbf16, #tpu.memory_space<vmem>>, %arg4: memref<1x256xf32, #tpu.memory_space<vmem>>, %arg5: memref<256x64xbf16, #tpu.memory_space<vmem>>, %arg6: memref<2x256x64xbf16, #tpu.memory_space<vmem>>, %arg7: memref<1x64xf32, #tpu.memory_space<vmem>>, %arg8: memref<16x64xf32, #tpu.memory_space<vmem>>) attributes {dimension_semantics = [], scalar_prefetch = 0 : i64, scratch_operands = 0 : i64, tpu.core_type = #tpu.core_type<tc>} {
    %c0 = arith.constant 0 : index
    %c0_0 = arith.constant 0 : index
    %0 = vector.load %arg1[%c0, %c0_0] : memref<16x512xf32, #tpu.memory_space<vmem>>, vector<16x512xf32>
    %1 = arith.truncf %0 : vector<16x512xf32> to vector<16x512xbf16>
    %c0_1 = arith.constant 0 : index
    %c0_2 = arith.constant 0 : index
    %2 = vector.load %arg2[%c0_1, %c0_2] : memref<512x256xbf16, #tpu.memory_space<vmem>>, vector<512x256xbf16>
    %cst = arith.constant dense<0.000000e+00> : vector<16x256xf32>
    %3 = tpu.matmul %1, %2, %cst {dimension_numbers = #tpu.dot_dimension_numbers<[1], [0], [0], [1], [0, 0, 1, 1], [], []>} : vector<16x512xbf16>, vector<512x256xbf16>, vector<16x256xf32> -> vector<16x256xf32>
    %c0_3 = arith.constant 0 : index
    %c0_4 = arith.constant 0 : index
    %c0_5 = arith.constant 0 : index
    %4 = vector.load %arg0[%c0_3, %c0_4, %c0_5] : memref<2x16x16xbf16, #tpu.memory_space<vmem>>, vector<1x16x16xbf16>
    %5 = vector.shape_cast %4 : vector<1x16x16xbf16> to vector<16x16xbf16>
    %cst_6 = arith.constant dense<0.000000e+00> : vector<16x512xf32>
    %6 = tpu.matmul %5, %1, %cst_6 {dimension_numbers = #tpu.dot_dimension_numbers<[1], [0], [0], [1], [0, 0, 1, 1], [], []>} : vector<16x16xbf16>, vector<16x512xbf16>, vector<16x512xf32> -> vector<16x512xf32>
    %7 = arith.truncf %6 : vector<16x512xf32> to vector<16x512xbf16>
    %c0_7 = arith.constant 0 : index
    %c0_8 = arith.constant 0 : index
    %c0_9 = arith.constant 0 : index
    %8 = vector.load %arg3[%c0_7, %c0_8, %c0_9] : memref<2x512x256xbf16, #tpu.memory_space<vmem>>, vector<1x512x256xbf16>
    %9 = vector.shape_cast %8 : vector<1x512x256xbf16> to vector<512x256xbf16>
    %cst_10 = arith.constant dense<0.000000e+00> : vector<16x256xf32>
    %10 = tpu.matmul %7, %9, %cst_10 {dimension_numbers = #tpu.dot_dimension_numbers<[1], [0], [0], [1], [0, 0, 1, 1], [], []>} : vector<16x512xbf16>, vector<512x256xbf16>, vector<16x256xf32> -> vector<16x256xf32>
    %11 = arith.addf %3, %10 : vector<16x256xf32>
    %c1 = arith.constant 1 : index
    %c0_11 = arith.constant 0 : index
    %c0_12 = arith.constant 0 : index
    %12 = vector.load %arg0[%c1, %c0_11, %c0_12] : memref<2x16x16xbf16, #tpu.memory_space<vmem>>, vector<1x16x16xbf16>
    %13 = vector.shape_cast %12 : vector<1x16x16xbf16> to vector<16x16xbf16>
    %cst_13 = arith.constant dense<0.000000e+00> : vector<16x512xf32>
    %14 = tpu.matmul %13, %1, %cst_13 {dimension_numbers = #tpu.dot_dimension_numbers<[1], [0], [0], [1], [0, 0, 1, 1], [], []>} : vector<16x16xbf16>, vector<16x512xbf16>, vector<16x512xf32> -> vector<16x512xf32>
    %15 = arith.truncf %14 : vector<16x512xf32> to vector<16x512xbf16>
    %c1_14 = arith.constant 1 : index
    %c0_15 = arith.constant 0 : index
    %c0_16 = arith.constant 0 : index
    %16 = vector.load %arg3[%c1_14, %c0_15, %c0_16] : memref<2x512x256xbf16, #tpu.memory_space<vmem>>, vector<1x512x256xbf16>
    %17 = vector.shape_cast %16 : vector<1x512x256xbf16> to vector<512x256xbf16>
    %cst_17 = arith.constant dense<0.000000e+00> : vector<16x256xf32>
    %18 = tpu.matmul %15, %17, %cst_17 {dimension_numbers = #tpu.dot_dimension_numbers<[1], [0], [0], [1], [0, 0, 1, 1], [], []>} : vector<16x512xbf16>, vector<512x256xbf16>, vector<16x256xf32> -> vector<16x256xf32>
    %19 = arith.addf %11, %18 : vector<16x256xf32>
    %c0_18 = arith.constant 0 : index
    %c0_19 = arith.constant 0 : index
    %20 = vector.load %arg4[%c0_18, %c0_19] : memref<1x256xf32, #tpu.memory_space<vmem>>, vector<1x256xf32>
    %21 = vector.broadcast %20 : vector<1x256xf32> to vector<16x256xf32>
    %22 = arith.addf %19, %21 : vector<16x256xf32>
    %cst_20 = arith.constant 0.000000e+00 : f32
    %23 = vector.broadcast %cst_20 : f32 to vector<16x256xf32>
    %24 = arith.maximumf %22, %23 : vector<16x256xf32>
    %25 = arith.truncf %24 : vector<16x256xf32> to vector<16x256xbf16>
    %c0_21 = arith.constant 0 : index
    %c0_22 = arith.constant 0 : index
    %26 = vector.load %arg5[%c0_21, %c0_22] : memref<256x64xbf16, #tpu.memory_space<vmem>>, vector<256x64xbf16>
    %cst_23 = arith.constant dense<0.000000e+00> : vector<16x64xf32>
    %27 = tpu.matmul %25, %26, %cst_23 {dimension_numbers = #tpu.dot_dimension_numbers<[1], [0], [0], [1], [0, 0, 1, 1], [], []>} : vector<16x256xbf16>, vector<256x64xbf16>, vector<16x64xf32> -> vector<16x64xf32>
    %c0_24 = arith.constant 0 : index
    %c0_25 = arith.constant 0 : index
    %c0_26 = arith.constant 0 : index
    %28 = vector.load %arg0[%c0_24, %c0_25, %c0_26] : memref<2x16x16xbf16, #tpu.memory_space<vmem>>, vector<1x16x16xbf16>
    %29 = vector.shape_cast %28 : vector<1x16x16xbf16> to vector<16x16xbf16>
    %cst_27 = arith.constant dense<0.000000e+00> : vector<16x256xf32>
    %30 = tpu.matmul %29, %25, %cst_27 {dimension_numbers = #tpu.dot_dimension_numbers<[1], [0], [0], [1], [0, 0, 1, 1], [], []>} : vector<16x16xbf16>, vector<16x256xbf16>, vector<16x256xf32> -> vector<16x256xf32>
    %31 = arith.truncf %30 : vector<16x256xf32> to vector<16x256xbf16>
    %c0_28 = arith.constant 0 : index
    %c0_29 = arith.constant 0 : index
    %c0_30 = arith.constant 0 : index
    %32 = vector.load %arg6[%c0_28, %c0_29, %c0_30] : memref<2x256x64xbf16, #tpu.memory_space<vmem>>, vector<1x256x64xbf16>
    %33 = vector.shape_cast %32 : vector<1x256x64xbf16> to vector<256x64xbf16>
    %cst_31 = arith.constant dense<0.000000e+00> : vector<16x64xf32>
    %34 = tpu.matmul %31, %33, %cst_31 {dimension_numbers = #tpu.dot_dimension_numbers<[1], [0], [0], [1], [0, 0, 1, 1], [], []>} : vector<16x256xbf16>, vector<256x64xbf16>, vector<16x64xf32> -> vector<16x64xf32>
    %35 = arith.addf %27, %34 : vector<16x64xf32>
    %c1_32 = arith.constant 1 : index
    %c0_33 = arith.constant 0 : index
    %c0_34 = arith.constant 0 : index
    %36 = vector.load %arg0[%c1_32, %c0_33, %c0_34] : memref<2x16x16xbf16, #tpu.memory_space<vmem>>, vector<1x16x16xbf16>
    %37 = vector.shape_cast %36 : vector<1x16x16xbf16> to vector<16x16xbf16>
    %cst_35 = arith.constant dense<0.000000e+00> : vector<16x256xf32>
    %38 = tpu.matmul %37, %25, %cst_35 {dimension_numbers = #tpu.dot_dimension_numbers<[1], [0], [0], [1], [0, 0, 1, 1], [], []>} : vector<16x16xbf16>, vector<16x256xbf16>, vector<16x256xf32> -> vector<16x256xf32>
    %39 = arith.truncf %38 : vector<16x256xf32> to vector<16x256xbf16>
    %c1_36 = arith.constant 1 : index
    %c0_37 = arith.constant 0 : index
    %c0_38 = arith.constant 0 : index
    %40 = vector.load %arg6[%c1_36, %c0_37, %c0_38] : memref<2x256x64xbf16, #tpu.memory_space<vmem>>, vector<1x256x64xbf16>
    %41 = vector.shape_cast %40 : vector<1x256x64xbf16> to vector<256x64xbf16>
    %cst_39 = arith.constant dense<0.000000e+00> : vector<16x64xf32>
    %42 = tpu.matmul %39, %41, %cst_39 {dimension_numbers = #tpu.dot_dimension_numbers<[1], [0], [0], [1], [0, 0, 1, 1], [], []>} : vector<16x256xbf16>, vector<256x64xbf16>, vector<16x64xf32> -> vector<16x64xf32>
    %43 = arith.addf %35, %42 : vector<16x64xf32>
    %c0_40 = arith.constant 0 : index
    %c0_41 = arith.constant 0 : index
    %44 = vector.load %arg7[%c0_40, %c0_41] : memref<1x64xf32, #tpu.memory_space<vmem>>, vector<1x64xf32>
    %45 = vector.broadcast %44 : vector<1x64xf32> to vector<16x64xf32>
    %46 = arith.addf %43, %45 : vector<16x64xf32>
    %c0_42 = arith.constant 0 : index
    %c0_43 = arith.constant 0 : index
    %47 = vector.load %arg8[%c0_42, %c0_43] : memref<16x64xf32, #tpu.memory_space<vmem>>, vector<16x64xf32>
    tpu.vector_store %arg8[%c0_42, %c0_43], %46 {strides = array<i32>} : memref<16x64xf32, #tpu.memory_space<vmem>>, vector<16x64xf32>,
    return
  }
}

</mosaic_0001>

<bundles_post_ra>
// kernel: double_sage_forward.1
= control target key start
LH: loop header
LB: loop body
LE: loop exit
PB: predicated region body
PF: predicated region fallthrough
CT: control target
= control target key end

     0   :  { %13 = vsyncpa [#allocation3], 0  ;;  %s3583_s0 = inlined_call_operand.vmem [shape: bf16[2,16,16], index: 0, kind: input, shape index: {}]   ;;  %s3584_s1 = inlined_call_operand.vmem [shape: f32[16,512], index: 1, kind: input, shape index: {}]   ;;  %s3585_s2 = inlined_call_operand.vmem [shape: bf16[512,256], index: 2, kind: input, shape index: {}]   ;;  %s3586_s3 = inlined_call_operand.hbm [shape: bf16[2,512,256], index: 3, kind: input, shape index: {}]   ;;  %s3587_s4 = inlined_call_operand.hbm [shape: f32[1,256], index: 4, kind: input, shape index: {}]   ;;  %s3588_s5 = inlined_call_operand.vmem [shape: bf16[256,64], index: 5, kind: input, shape index: {}]   ;;  %s3589_s6 = inlined_call_operand.vmem [shape: bf16[2,256,64], index: 6, kind: input, shape index: {}]   ;;  %s3590_s7 = inlined_call_operand.hbm [shape: f32[1,64], index: 7, kind: input, shape index: {}]   ;;  %s3591_s8 = inlined_call_operand.vmem [shape: f32[16,64], index: 8, kind: output, shape index: {}]  }
   0x1   :  { %14 = vsyncpa [#allocation5], 0  ;;  %s3094_s27 = smov [#allocation4]   ;;  %s3095_s29 = smov [#allocation2]  }
   0x2   :  { %s39_s28 = sshll.u32 %s3094_s27, 4  ;;  %s26_s30 = sshll.u32 %s3095_s29, 4  ;;  %s40_s28 = int_to_ptr.vmem [resolvable:$true] %s39_s28  ;;  %s27_s30 = int_to_ptr.vmem [resolvable:$true] %s26_s30 }
   0x3   :  { %s3038_s9 = scalar_lea.vmem %s40_s28, 32  ;;  %p3043_p1 = scmp.lt.s32.totalorder %s40_s28, %s40_s28 }
   0x4   :  { %p3039_p0 = scmp.ne.s32.totalorder %s40_s28, %s3038_s9  ;;  %p3044_p2 = scmp.lt.s32.totalorder %s3038_s9, %s3038_s9 }
   0x6   :  { %p3045_p3 = por %p3044_p2, %p3043_p1 }
   0x8   :  { %p3046_p4 = pnand %p3045_p3, %p3039_p0 }
   0xa   :  { %3049 = shalt.err (!%p3046_p4)
}
   0xb   :  { %42 = dma.hbm_to_vmem [thread:$0]  %s3587_s4, 32, %s40_s28, [#allocation5]  }
   0xc   :  { %s3058_s12 = scalar_lea.vmem %s27_s30, 16384  ;;  %p3063_p6 = scmp.lt.s32.totalorder %s27_s30, %s27_s30 }
   0xd   :  { %p3059_p5 = scmp.ne.s32.totalorder %s27_s30, %s3058_s12  ;;  %p3064_p7 = scmp.lt.s32.totalorder %s3058_s12, %s3058_s12 }
   0xf   :  { %p3065_p8 = por %p3064_p7, %p3063_p6 }
  0x11   :  { %p3066_p9 = pnand %p3065_p8, %p3059_p5 }
  0x13   :  { %3069 = shalt.err (!%p3066_p9)
}
  0x14   :  { %s3096_s13 = smov 128   ;;  %s3097_s14 = smov 8  }
  0x15   :  { %32 = dma.hbm_to_vmem [thread:$0]  %s3586_s3, 16384, %s27_s30, [#allocation3], %s3096_s13, %s3096_s13, %s3097_s14  }
  0x16   :  { %s3098_s17 = smov [#allocation6]  }
  0x17   :  { %s53_s18 = sshll.u32 %s3098_s17, 4  ;;  %s54_s18 = int_to_ptr.vmem [resolvable:$true] %s53_s18 }
  0x18   :  { %s3078_s19 = scalar_lea.vmem %s54_s18, 16  ;;  %s3082_s20 = scalar_lea.vmem %s54_s18, 32 }
  0x19   :  { %p3079_p10 = scmp.ne.s32.totalorder %s54_s18, %s3078_s19  ;;  %p3083_p11 = scmp.lt.s32.totalorder %s54_s18, %s54_s18 }
  0x1a   :  { %p3084_p12 = scmp.lt.s32.totalorder %s3082_s20, %s3078_s19 }
  0x1c   :  { %p3085_p13 = por %p3084_p12, %p3083_p11 }
  0x1e   :  { %p3086_p0 = pnand %p3085_p13, %p3079_p10 }
  0x20   :  { %3089 = shalt.err (!%p3086_p0)
}
  0x21   :  { %56 = dma.hbm_to_vmem [thread:$0]  %s3590_s7, 16, %s54_s18, [#allocation5]  }
  0x22   :  { %3090 = dma.done.wait [#allocation3], 16384  }
  0x23   :  { %3091 = vsyncadd [#allocation3], 4294950912 }
  0x24   :  { %3092 = dma.done.wait [#allocation5], 48  }
  0x25   :  { %3093 = vsyncadd [#allocation5], 4294967248  ;;  %v3099_v0 = vmov 0   ;;  %v68_v1 = vld [vmem:[%s3584_s1 + $0x8] sm:$0xff]  ;;  %v70_v3 = vld [vmem:[%s3584_s1 + $0x18] sm:$0xff]  ;;  %vm150_vm0 = vcmask 130048  }
  0x26   :  { %186 = vmatprep.mubr.bf16.mxu0 %v3099_v0  ;;  %229 = vmatprep.mubr.bf16.mxu1 %v3099_v0  ;;  %v72_v2 = vld [vmem:[%s3584_s1 + $0x28] sm:$0xff]  ;;  %v74_v5 = vld [vmem:[%s3584_s1 + $0x38] sm:$0xff]  ;;  %v67_v6 = vld [vmem:[%s3584_s1] sm:$0xff]  ;;  %vm2327_vm1 = vcmask 523264  }
  0x27   :  { %v3165_v4 = vpack.c.bf16 %v72_v2, %v68_v1  ;;  %v71_v7 = vld [vmem:[%s3584_s1 + $0x20] sm:$0xff]  ;;  %v3176_v8 = vpack.c.bf16 %v74_v5, %v70_v3  ;;  %v69_v10 = vld [vmem:[%s3584_s1 + $0x10] sm:$0xff] }
  0x28   :  { %v3178_v9 = vpack.c.bf16 %v71_v7, %v67_v6  ;;  %v73_v11 = vld [vmem:[%s3584_s1 + $0x30] sm:$0xff]  ;;  %v2691_v13 = vld [vmem:[%s3583_s0] sm:$0xff]  }
  0x29   :  { %168 = vmatprep.subr.bf16.mxu0 %v3165_v4  ;;  %v3187_v12 = vpack.c.bf16 %v73_v11, %v69_v10  ;;  %211 = vmatprep.subr.bf16.mxu1 %v3176_v8  ;;  %v2692_v14 = vld [vmem:[#allocation2 + $0x70] ss:$8 sps:$4 sm:$0xff]   ;;  %v2694_v15 = vld [vmem:[#allocation2 + $0x74] ss:$8 sps:$4 sm:$0xff]   ;;  %v2700_v18 = vld [vmem:[#allocation2 + $0x64] ss:$8 sps:$4 sm:$0xff]  }
  0x2a   :  { %169 = vmatpush1.bf16.msra.mxu0 %v3178_v9  ;;  %v2695_v16 = vld [vmem:[#allocation2 + $0x170] ss:$8 sps:$4 sm:$0xff]   ;;  %v2697_v17 = vld [vmem:[#allocation2 + $0x174] ss:$8 sps:$4 sm:$0xff]   ;;  %v2698_v19 = vld [vmem:[#allocation2 + $0x60] ss:$8 sps:$4 sm:$0xff]  }
  0x2b   :  { %212 = vmatpush1.bf16.msra.mxu1 %v3187_v12  ;;  %628 = vmatprep.subr.bf16.mxu0 %v2694_v15  ;;  %v2703_v20 = vld [vmem:[#allocation2 + $0x164] ss:$8 sps:$4 sm:$0xff]   ;;  %v2701_v21 = vld [vmem:[#allocation2 + $0x160] ss:$8 sps:$4 sm:$0xff]   ;;  %v2706_v22 = vld [vmem:[#allocation2 + $0x54] ss:$8 sps:$4 sm:$0xff]  }
  0x2c   :  { %671 = vmatprep.subr.bf16.mxu1 %v2697_v17  ;;  %v2709_v23 = vld [vmem:[#allocation2 + $0x154] ss:$8 sps:$4 sm:$0xff]   ;;  %v2704_v24 = vld [vmem:[#allocation2 + $0x50] ss:$8 sps:$4 sm:$0xff]   ;;  %v2712_v26 = vld [vmem:[#allocation2 + $0x44] ss:$8 sps:$4 sm:$0xff]  }
  0x2d   :  { %2337 = vmatmul.mubr.msk.bf16.vlgmr.msra.gmra.mxu0 %vm150_vm0, %v2691_v13  ;;  %v2707_v25 = vld [vmem:[#allocation2 + $0x150] ss:$8 sps:$4 sm:$0xff]   ;;  %v2715_v27 = vld [vmem:[#allocation2 + $0x144] ss:$8 sps:$4 sm:$0xff]   ;;  %v2710_v28 = vld [vmem:[#allocation2 + $0x40] ss:$8 sps:$4 sm:$0xff]  }
  0x2e   :  { %2338 = vmatmul.mubr.msk.bf16.vlgmr.msra.gmra.mxu1 %vm150_vm0, %v2691_v13  ;;  %629 = vmatpush1.bf16.msra.mxu0 %v2692_v14  ;;  %v2713_v29 = vld [vmem:[#allocation2 + $0x140] ss:$8 sps:$4 sm:$0xff]   ;;  %v2718_v30 = vld [vmem:[#allocation2 + $0x34] ss:$8 sps:$4 sm:$0xff]   ;;  %v2716_v32 = vld [vmem:[#allocation2 + $0x30] ss:$8 sps:$4 sm:$0xff]  }
  0x2f   :  { %672 = vmatpush1.bf16.msra.mxu1 %v2695_v16  ;;  %630 = vmatprep.subr.bf16.mxu0 %v2700_v18  ;;  %v2721_v31 = vld [vmem:[#allocation2 + $0x134] ss:$8 sps:$4 sm:$0xff]   ;;  %v2719_v33 = vld [vmem:[#allocation2 + $0x130] ss:$8 sps:$4 sm:$0xff]   ;;  %v2724_v34 = vld [vmem:[#allocation2 + $0x24] ss:$8 sps:$4 sm:$0xff]  }
  0x30   :  { %673 = vmatprep.subr.bf16.mxu1 %v2703_v20  ;;  %v2727_v35 = vld [vmem:[#allocation2 + $0x124] ss:$8 sps:$4 sm:$0xff]   ;;  %v2722_v36 = vld [vmem:[#allocation2 + $0x20] ss:$8 sps:$4 sm:$0xff]   ;;  %v2730_v38 = vld [vmem:[#allocation2 + $0x14] ss:$8 sps:$4 sm:$0xff]  }
  0x31   :  { %v2725_v37 = vld [vmem:[#allocation2 + $0x120] ss:$8 sps:$4 sm:$0xff]   ;;  %v2733_v39 = vld [vmem:[#allocation2 + $0x114] ss:$8 sps:$4 sm:$0xff]   ;;  %v2728_v40 = vld [vmem:[#allocation2 + $0x10] ss:$8 sps:$4 sm:$0xff]  }
  0x32   :  { %631 = vmatpush1.bf16.msra.mxu0 %v2698_v19  ;;  %v2731_v41 = vld [vmem:[#allocation2 + $0x110] ss:$8 sps:$4 sm:$0xff]   ;;  %v2736_v42 = vld [vmem:[#allocation2 + $0x4] ss:$8 sps:$4 sm:$0xff]   ;;  %v2734_v44 = vld [vmem:[#allocation2] ss:$8 sps:$4 sm:$0xff]  }
  0x33   :  { %674 = vmatpush1.bf16.msra.mxu1 %v2701_v21  ;;  %632 = vmatprep.subr.bf16.mxu0 %v2706_v22  ;;  %v2739_v43 = vld [vmem:[#allocation2 + $0x104] ss:$8 sps:$4 sm:$0xff]   ;;  %v2737_v45 = vld [vmem:[#allocation2 + $0x100] ss:$8 sps:$4 sm:$0xff]   ;;  %v2742_v46 = vld [vmem:[#allocation2 + $0xf4] ss:$8 sps:$4 sm:$0xff]  }
  0x34   :  { %675 = vmatprep.subr.bf16.mxu1 %v2709_v23  ;;  %v2745_v47 = vld [vmem:[#allocation2 + $0x1f4] ss:$8 sps:$4 sm:$0xff]   ;;  %v2740_v48 = vld [vmem:[#allocation2 + $0xf0] ss:$8 sps:$4 sm:$0xff]   ;;  %v2748_v50 = vld [vmem:[#allocation2 + $0xe4] ss:$8 sps:$4 sm:$0xff]  }
  0x35   :  { %v2743_v49 = vld [vmem:[#allocation2 + $0x1f0] ss:$8 sps:$4 sm:$0xff]   ;;  %v2751_v51 = vld [vmem:[#allocation2 + $0x1e4] ss:$8 sps:$4 sm:$0xff]   ;;  %v2746_v52 = vld [vmem:[#allocation2 + $0xe0] ss:$8 sps:$4 sm:$0xff]  }
  0x36   :  { %633 = vmatpush1.bf16.msra.mxu0 %v2704_v24  ;;  %v2749_v53 = vld [vmem:[#allocation2 + $0x1e0] ss:$8 sps:$4 sm:$0xff]   ;;  %v2754_v54 = vld [vmem:[#allocation2 + $0xd4] ss:$8 sps:$4 sm:$0xff]   ;;  %v2752_v56 = vld [vmem:[#allocation2 + $0xd0] ss:$8 sps:$4 sm:$0xff]  }
  0x37   :  { %676 = vmatpush1.bf16.msra.mxu1 %v2707_v25  ;;  %634 = vmatprep.subr.bf16.mxu0 %v2712_v26  ;;  %v2757_v55 = vld [vmem:[#allocation2 + $0x1d4] ss:$8 sps:$4 sm:$0xff]   ;;  %v2755_v57 = vld [vmem:[#allocation2 + $0x1d0] ss:$8 sps:$4 sm:$0xff]   ;;  %v2760_v58 = vld [vmem:[#allocation2 + $0xc4] ss:$8 sps:$4 sm:$0xff]  }
  0x38   :  { %677 = vmatprep.subr.bf16.mxu1 %v2715_v27  ;;  %v2763_v59 = vld [vmem:[#allocation2 + $0x1c4] ss:$8 sps:$4 sm:$0xff]   ;;  %v2758_v60 = vld [vmem:[#allocation2 + $0xc0] ss:$8 sps:$4 sm:$0xff]   ;;  %v2766_v62 = vld [vmem:[#allocation2 + $0xb4] ss:$8 sps:$4 sm:$0xff]  }
  0x39   :  { %v2761_v61 = vld [vmem:[#allocation2 + $0x1c0] ss:$8 sps:$4 sm:$0xff]   ;;  %v2769_v63 = vld [vmem:[#allocation2 + $0x1b4] ss:$8 sps:$4 sm:$0xff]   ;;  %v2764_v1 = vld [vmem:[#allocation2 + $0xb0] ss:$8 sps:$4 sm:$0xff]  }
  0x3a   :  { %635 = vmatpush1.bf16.msra.mxu0 %v2710_v28  ;;  %v2767_v2 = vld [vmem:[#allocation2 + $0x1b0] ss:$8 sps:$4 sm:$0xff]   ;;  %v2772_v3 = vld [vmem:[#allocation2 + $0xa4] ss:$8 sps:$4 sm:$0xff]   ;;  %v2770_v6 = vld [vmem:[#allocation2 + $0xa0] ss:$8 sps:$4 sm:$0xff]  }
  0x3b   :  { %678 = vmatpush1.bf16.msra.mxu1 %v2713_v29  ;;  %636 = vmatprep.subr.bf16.mxu0 %v2718_v30  ;;  %v2775_v5 = vld [vmem:[#allocation2 + $0x1a4] ss:$8 sps:$4 sm:$0xff]   ;;  %v2773_v7 = vld [vmem:[#allocation2 + $0x1a0] ss:$8 sps:$4 sm:$0xff]   ;;  %v2778_v10 = vld [vmem:[#allocation2 + $0x94] ss:$8 sps:$4 sm:$0xff]  }
  0x3c   :  { %679 = vmatprep.subr.bf16.mxu1 %v2721_v31  ;;  %v2781_v11 = vld [vmem:[#allocation2 + $0x194] ss:$8 sps:$4 sm:$0xff]   ;;  %v2776_v13 = vld [vmem:[#allocation2 + $0x90] ss:$8 sps:$4 sm:$0xff]   ;;  %v2784_v15 = vld [vmem:[#allocation2 + $0x84] ss:$8 sps:$4 sm:$0xff]  }
  0x3d   :  { %v2779_v14 = vld [vmem:[#allocation2 + $0x190] ss:$8 sps:$4 sm:$0xff]   ;;  %v2787_v16 = vld [vmem:[#allocation2 + $0x184] ss:$8 sps:$4 sm:$0xff]   ;;  %v2782_v17 = vld [vmem:[#allocation2 + $0x80] ss:$8 sps:$4 sm:$0xff]  }
  0x3e   :  { %637 = vmatpush1.bf16.msra.mxu0 %v2716_v32  ;;  %v2785_v18 = vld [vmem:[#allocation2 + $0x180] ss:$8 sps:$4 sm:$0xff]   ;;  %v2790_v19 = vld [vmem:[%s3585_s2 + $0x74] ss:$8 sps:$4 sm:$0xff]   ;;  %v2788_v31 = vld [vmem:[%s3585_s2 + $0x70] ss:$8 sps:$4 sm:$0xff]  }
  0x3f   :  { %680 = vmatpush1.bf16.msra.mxu1 %v2719_v33  ;;  %638 = vmatprep.subr.bf16.mxu0 %v2724_v34  ;;  %v2793_v20 = vld [vmem:[%s3585_s2 + $0x174] ss:$8 sps:$4 sm:$0xff]   ;;  %v2791_v33 = vld [vmem:[%s3585_s2 + $0x170] ss:$8 sps:$4 sm:$0xff]   ;;  %v2796_v34 = vld [vmem:[%s3585_s2 + $0x64] ss:$8 sps:$4 sm:$0xff]  }
  0x40   :  { %681 = vmatprep.subr.bf16.mxu1 %v2727_v35 }
  0x42   :  { %639 = vmatpush1.bf16.msra.mxu0 %v2722_v36  ;;  %v2799_v36 = vld [vmem:[%s3585_s2 + $0x164] ss:$8 sps:$4 sm:$0xff]  }
  0x43   :  { %682 = vmatpush1.bf16.msra.mxu1 %v2725_v37  ;;  %640 = vmatprep.subr.bf16.mxu0 %v2730_v38  ;;  %v2794_v37 = vld [vmem:[%s3585_s2 + $0x60] ss:$8 sps:$4 sm:$0xff]  }
  0x44   :  { %683 = vmatprep.subr.bf16.mxu1 %v2733_v39  ;;  %v2797_v38 = vld [vmem:[%s3585_s2 + $0x160] ss:$8 sps:$4 sm:$0xff]   ;;  %v2802_v39 = vld [vmem:[%s3585_s2 + $0x54] ss:$8 sps:$4 sm:$0xff]  }
  0x46   :  { %641 = vmatpush1.bf16.msra.mxu0 %v2728_v40  ;;  %v2805_v40 = vld [vmem:[%s3585_s2 + $0x154] ss:$8 sps:$4 sm:$0xff]  }
  0x47   :  { %684 = vmatpush1.bf16.msra.mxu1 %v2731_v41  ;;  %642 = vmatprep.subr.bf16.mxu0 %v2736_v42  ;;  %v2800_v41 = vld [vmem:[%s3585_s2 + $0x50] ss:$8 sps:$4 sm:$0xff]  }
  0x48   :  { %685 = vmatprep.subr.bf16.mxu1 %v2739_v43  ;;  %v2803_v42 = vld [vmem:[%s3585_s2 + $0x150] ss:$8 sps:$4 sm:$0xff]   ;;  %v2808_v43 = vld [vmem:[%s3585_s2 + $0x44] ss:$8 sps:$4 sm:$0xff]  }
  0x4a   :  { %643 = vmatpush1.bf16.msra.mxu0 %v2734_v44  ;;  %v2811_v44 = vld [vmem:[%s3585_s2 + $0x144] ss:$8 sps:$4 sm:$0xff]  }
  0x4b   :  { %686 = vmatpush1.bf16.msra.mxu1 %v2737_v45  ;;  %644 = vmatprep.subr.bf16.mxu0 %v2742_v46  ;;  %v2806_v45 = vld [vmem:[%s3585_s2 + $0x40] ss:$8 sps:$4 sm:$0xff]  }
  0x4c   :  { %687 = vmatprep.subr.bf16.mxu1 %v2745_v47  ;;  %v2809_v46 = vld [vmem:[%s3585_s2 + $0x140] ss:$8 sps:$4 sm:$0xff]   ;;  %v2814_v47 = vld [vmem:[%s3585_s2 + $0x34] ss:$8 sps:$4 sm:$0xff]  }
  0x4e   :  { %645 = vmatpush2.bf16.msra.mxu0 %v2740_v48  ;;  %v2817_v48 = vld [vmem:[%s3585_s2 + $0x134] ss:$8 sps:$4 sm:$0xff]  }
  0x4f   :  { %688 = vmatpush2.bf16.msra.mxu1 %v2743_v49  ;;  %646 = vmatprep.subr.bf16.mxu0 %v2748_v50  ;;  %v2812_v49 = vld [vmem:[%s3585_s2 + $0x30] ss:$8 sps:$4 sm:$0xff]  }
  0x50   :  { %689 = vmatprep.subr.bf16.mxu1 %v2751_v51  ;;  %v2815_v50 = vld [vmem:[%s3585_s2 + $0x130] ss:$8 sps:$4 sm:$0xff]   ;;  %v2820_v51 = vld [vmem:[%s3585_s2 + $0x24] ss:$8 sps:$4 sm:$0xff]  }
  0x52   :  { %647 = vmatpush2.bf16.msra.mxu0 %v2746_v52  ;;  %v2823_v52 = vld [vmem:[%s3585_s2 + $0x124] ss:$8 sps:$4 sm:$0xff]  }
  0x53   :  { %690 = vmatpush2.bf16.msra.mxu1 %v2749_v53  ;;  %648 = vmatprep.subr.bf16.mxu0 %v2754_v54  ;;  %v2818_v53 = vld [vmem:[%s3585_s2 + $0x20] ss:$8 sps:$4 sm:$0xff]  }
  0x54   :  { %691 = vmatprep.subr.bf16.mxu1 %v2757_v55  ;;  %v2821_v54 = vld [vmem:[%s3585_s2 + $0x120] ss:$8 sps:$4 sm:$0xff]   ;;  %v2826_v55 = vld [vmem:[%s3585_s2 + $0x14] ss:$8 sps:$4 sm:$0xff]  }
  0x56   :  { %649 = vmatpush2.bf16.msra.mxu0 %v2752_v56  ;;  %v2829_v56 = vld [vmem:[%s3585_s2 + $0x114] ss:$8 sps:$4 sm:$0xff]  }
  0x57   :  { %692 = vmatpush2.bf16.msra.mxu1 %v2755_v57  ;;  %650 = vmatprep.subr.bf16.mxu0 %v2760_v58  ;;  %v2824_v57 = vld [vmem:[%s3585_s2 + $0x10] ss:$8 sps:$4 sm:$0xff]  }
  0x58   :  { %693 = vmatprep.subr.bf16.mxu1 %v2763_v59  ;;  %v2827_v58 = vld [vmem:[%s3585_s2 + $0x110] ss:$8 sps:$4 sm:$0xff]   ;;  %v2832_v59 = vld [vmem:[%s3585_s2 + $0x4] ss:$8 sps:$4 sm:$0xff]  }
  0x5a   :  { %651 = vmatpush2.bf16.msra.mxu0 %v2758_v60  ;;  %v2835_v60 = vld [vmem:[%s3585_s2 + $0x104] ss:$8 sps:$4 sm:$0xff]  }
  0x5b   :  { %694 = vmatpush2.bf16.msra.mxu1 %v2761_v61  ;;  %652 = vmatprep.subr.bf16.mxu0 %v2766_v62  ;;  %v2830_v61 = vld [vmem:[%s3585_s2] ss:$8 sps:$4 sm:$0xff]  }
  0x5c   :  { %695 = vmatprep.subr.bf16.mxu1 %v2769_v63  ;;  %v2833_v62 = vld [vmem:[%s3585_s2 + $0x100] ss:$8 sps:$4 sm:$0xff]   ;;  %v2838_v63 = vld [vmem:[%s3585_s2 + $0xf4] ss:$8 sps:$4 sm:$0xff]  }
  0x5e   :  { %653 = vmatpush2.bf16.msra.mxu0 %v2764_v1  ;;  %v2841_v1 = vld [vmem:[%s3585_s2 + $0x1f4] ss:$8 sps:$4 sm:$0xff]  }
  0x5f   :  { %696 = vmatpush2.bf16.msra.mxu1 %v2767_v2  ;;  %654 = vmatprep.subr.bf16.mxu0 %v2772_v3  ;;  %v2836_v2 = vld [vmem:[%s3585_s2 + $0xf0] ss:$8 sps:$4 sm:$0xff]  }
  0x60   :  { %697 = vmatprep.subr.bf16.mxu1 %v2775_v5  ;;  %v2839_v3 = vld [vmem:[%s3585_s2 + $0x1f0] ss:$8 sps:$4 sm:$0xff]   ;;  %v2844_v5 = vld [vmem:[%s3585_s2 + $0xe4] ss:$8 sps:$4 sm:$0xff]  }
  0x62   :  { %655 = vmatpush2.bf16.msra.mxu0 %v2770_v6  ;;  %v2847_v6 = vld [vmem:[%s3585_s2 + $0x1e4] ss:$8 sps:$4 sm:$0xff]  }
  0x63   :  { %698 = vmatpush2.bf16.msra.mxu1 %v2773_v7  ;;  %656 = vmatprep.subr.bf16.mxu0 %v2778_v10  ;;  %v2842_v7 = vld [vmem:[%s3585_s2 + $0xe0] ss:$8 sps:$4 sm:$0xff]  }
  0x64   :  { %699 = vmatprep.subr.bf16.mxu1 %v2781_v11  ;;  %v2845_v10 = vld [vmem:[%s3585_s2 + $0x1e0] ss:$8 sps:$4 sm:$0xff]   ;;  %v2850_v11 = vld [vmem:[%s3585_s2 + $0xd4] ss:$8 sps:$4 sm:$0xff]  }
  0x66   :  { %657 = vmatpush2.bf16.msra.mxu0 %v2776_v13  ;;  %v2853_v13 = vld [vmem:[%s3585_s2 + $0x1d4] ss:$8 sps:$4 sm:$0xff]  }
  0x67   :  { %700 = vmatpush2.bf16.msra.mxu1 %v2779_v14  ;;  %658 = vmatprep.subr.bf16.mxu0 %v2784_v15  ;;  %v2848_v14 = vld [vmem:[%s3585_s2 + $0xd0] ss:$8 sps:$4 sm:$0xff]  }
  0x68   :  { %701 = vmatprep.subr.bf16.mxu1 %v2787_v16  ;;  %v2851_v15 = vld [vmem:[%s3585_s2 + $0x1d0] ss:$8 sps:$4 sm:$0xff]   ;;  %v2856_v16 = vld [vmem:[%s3585_s2 + $0xc4] ss:$8 sps:$4 sm:$0xff]  }
  0x6a   :  { %659 = vmatpush2.bf16.msra.mxu0 %v2782_v17  ;;  %v2859_v17 = vld [vmem:[%s3585_s2 + $0x1c4] ss:$8 sps:$4 sm:$0xff]  }
  0x6b   :  { %702 = vmatpush2.bf16.msra.mxu1 %v2785_v18  ;;  %1034 = vmatprep.subr.bf16.mxu0 %v2790_v19  ;;  %v2854_v18 = vld [vmem:[%s3585_s2 + $0xc0] ss:$8 sps:$4 sm:$0xff]  }
  0x6c   :  { %1077 = vmatprep.subr.bf16.mxu1 %v2793_v20  ;;  %v2857_v19 = vld [vmem:[%s3585_s2 + $0x1c0] ss:$8 sps:$4 sm:$0xff]   ;;  %v2862_v20 = vld [vmem:[%s3585_s2 + $0xb4] ss:$8 sps:$4 sm:$0xff]  }
  0xed   :  { %v188_v21 = vpop.f32.mrf.mxu0 }
  0xee   :  { %v231_v22 = vpop.f32.mrf.mxu1 }
  0xef   :  { %v190_v23 = vpop.f32.mrf.mxu0 }
  0xf0   :  { %v233_v24 = vpop.f32.mrf.mxu1 }
  0xf1   :  { %v192_v25 = vpop.f32.mrf.mxu0 }
  0xf2   :  { %v235_v26 = vpop.f32.mrf.mxu1  ;;  %v240_v27 = vpack.c.bf16 %v192_v25, %v188_v21  ;;  %v2865_v21 = vld [vmem:[%s3585_s2 + $0x1b4] ss:$8 sps:$4 sm:$0xff]   ;;  %v2871_v25 = vld [vmem:[%s3585_s2 + $0x1a4] ss:$8 sps:$4 sm:$0xff]  }
  0xf3   :  { %v194_v28 = vpop.f32.mrf.mxu0  ;;  %v242_v35 = vpack.c.bf16 %v235_v26, %v231_v22  ;;  %v2860_v22 = vld [vmem:[%s3585_s2 + $0xb0] ss:$8 sps:$4 sm:$0xff]   ;;  %v2866_v26 = vld [vmem:[%s3585_s2 + $0xa0] ss:$8 sps:$4 sm:$0xff]  }
  0xf4   :  { %v241_v29 = vpack.c.bf16 %v194_v28, %v190_v23  ;;  %v237_v30 = vpop.f32.mrf.mxu1  ;;  %v2863_v23 = vld [vmem:[%s3585_s2 + $0x1b0] ss:$8 sps:$4 sm:$0xff]   ;;  %v2874_v28 = vld [vmem:[%s3585_s2 + $0x94] ss:$8 sps:$4 sm:$0xff]  }
  0xf5   :  { %v243_v32 = vpack.c.bf16 %v237_v30, %v233_v24  ;;  %v2868_v24 = vld [vmem:[%s3585_s2 + $0xa4] ss:$8 sps:$4 sm:$0xff]   ;;  %v2872_v30 = vld [vmem:[%s3585_s2 + $0x90] ss:$8 sps:$4 sm:$0xff]  }
  0xf6   :  { %660 = vmatprep.mubr.bf16.mxu0 %v241_v29  ;;  %v2877_v29 = vld [vmem:[%s3585_s2 + $0x194] ss:$8 sps:$4 sm:$0xff]  }
  0xf7   :  { %703 = vmatprep.mubr.bf16.mxu1 %v243_v32  ;;  %661 = vmatmul.mubr.bf16.vlgmr.msra.gmra.mxu0 %v240_v27  ;;  %v2869_v27 = vld [vmem:[%s3585_s2 + $0x1a0] ss:$8 sps:$4 sm:$0xff]   ;;  %v2880_v32 = vld [vmem:[%s3585_s2 + $0x84] ss:$8 sps:$4 sm:$0xff]  }
  0xf8   :  { %704 = vmatmul.mubr.bf16.vlgmr.msra.gmra.mxu1 %v242_v35  ;;  %1035 = vmatpush1.bf16.msra.mxu0 %v2788_v31  ;;  %v2875_v31 = vld [vmem:[%s3585_s2 + $0x190] ss:$8 sps:$4 sm:$0xff]   ;;  %v2881_v35 = vld [vmem:[%s3585_s2 + $0x180] ss:$8 sps:$4 sm:$0xff]  }
  0xf9   :  { %1078 = vmatpush1.bf16.msra.mxu1 %v2791_v33  ;;  %1036 = vmatprep.subr.bf16.mxu0 %v2796_v34  ;;  %v2883_v33 = vld [vmem:[%s3585_s2 + $0x184] ss:$8 sps:$4 sm:$0xff]   ;;  %v2878_v34 = vld [vmem:[%s3585_s2 + $0x80] ss:$8 sps:$4 sm:$0xff]  }
  0xfa   :  { %1079 = vmatprep.subr.bf16.mxu1 %v2799_v36  ;;  %1066 = vmatprep.mubr.bf16.mxu0 %v3165_v4  ;;  %v3400_v36 = vld [vmem:[%s3583_s0 + $0x8] sm:$0xff]  }
  0xfb   :  { %1109 = vmatprep.mubr.bf16.mxu1 %v3176_v8 }
  0xfc   :  { %1037 = vmatpush1.bf16.msra.mxu0 %v2794_v37  ;;  %v2885_v37 = vld [vmem:[#allocation2 + $0x270] ss:$8 sps:$4 sm:$0xff]  }
  0xfd   :  { %1080 = vmatpush1.bf16.msra.mxu1 %v2797_v38  ;;  %1038 = vmatprep.subr.bf16.mxu0 %v2802_v39  ;;  %v2887_v38 = vld [vmem:[#allocation2 + $0x274] ss:$8 sps:$4 sm:$0xff]   ;;  %v2888_v39 = vld [vmem:[#allocation2 + $0x260] ss:$8 sps:$4 sm:$0xff]  }
  0xfe   :  { %1081 = vmatprep.subr.bf16.mxu1 %v2805_v40  ;;  %v2894_v40 = vld [vmem:[#allocation2 + $0x370] ss:$8 sps:$4 sm:$0xff]  }
 0x100   :  { %1039 = vmatpush1.bf16.msra.mxu0 %v2800_v41  ;;  %v2902_v41 = vld [vmem:[#allocation2 + $0x364] ss:$8 sps:$4 sm:$0xff]  }
 0x101   :  { %1082 = vmatpush1.bf16.msra.mxu1 %v2803_v42  ;;  %1040 = vmatprep.subr.bf16.mxu0 %v2808_v43  ;;  %v2891_v42 = vld [vmem:[#allocation2 + $0x250] ss:$8 sps:$4 sm:$0xff]   ;;  %v2899_v43 = vld [vmem:[#allocation2 + $0x244] ss:$8 sps:$4 sm:$0xff]  }
 0x102   :  { %1083 = vmatprep.subr.bf16.mxu1 %v2811_v44  ;;  %v2908_v44 = vld [vmem:[#allocation2 + $0x354] ss:$8 sps:$4 sm:$0xff]  }
 0x104   :  { %1041 = vmatpush1.bf16.msra.mxu0 %v2806_v45  ;;  %v2897_v45 = vld [vmem:[#allocation2 + $0x240] ss:$8 sps:$4 sm:$0xff]  }
 0x105   :  { %1084 = vmatpush1.bf16.msra.mxu1 %v2809_v46  ;;  %1042 = vmatprep.subr.bf16.mxu0 %v2814_v47  ;;  %v2905_v46 = vld [vmem:[#allocation2 + $0x234] ss:$8 sps:$4 sm:$0xff]   ;;  %v2906_v47 = vld [vmem:[#allocation2 + $0x350] ss:$8 sps:$4 sm:$0xff]  }
 0x106   :  { %1085 = vmatprep.subr.bf16.mxu1 %v2817_v48  ;;  %v2914_v48 = vld [vmem:[#allocation2 + $0x344] ss:$8 sps:$4 sm:$0xff]  }
 0x108   :  { %1043 = vmatpush1.bf16.msra.mxu0 %v2812_v49  ;;  %v2903_v49 = vld [vmem:[#allocation2 + $0x230] ss:$8 sps:$4 sm:$0xff]  }
 0x109   :  { %1086 = vmatpush1.bf16.msra.mxu1 %v2815_v50  ;;  %1044 = vmatprep.subr.bf16.mxu0 %v2820_v51  ;;  %v2911_v50 = vld [vmem:[#allocation2 + $0x224] ss:$8 sps:$4 sm:$0xff]   ;;  %v2912_v51 = vld [vmem:[#allocation2 + $0x340] ss:$8 sps:$4 sm:$0xff]  }
 0x10a   :  { %1087 = vmatprep.subr.bf16.mxu1 %v2823_v52  ;;  %v2920_v52 = vld [vmem:[#allocation2 + $0x334] ss:$8 sps:$4 sm:$0xff]  }
 0x10c   :  { %1045 = vmatpush1.bf16.msra.mxu0 %v2818_v53  ;;  %v2909_v53 = vld [vmem:[#allocation2 + $0x220] ss:$8 sps:$4 sm:$0xff]  }
 0x10d   :  { %1088 = vmatpush1.bf16.msra.mxu1 %v2821_v54  ;;  %1046 = vmatprep.subr.bf16.mxu0 %v2826_v55  ;;  %v2917_v54 = vld [vmem:[#allocation2 + $0x214] ss:$8 sps:$4 sm:$0xff]   ;;  %v2918_v55 = vld [vmem:[#allocation2 + $0x330] ss:$8 sps:$4 sm:$0xff]  }
 0x10e   :  { %1089 = vmatprep.subr.bf16.mxu1 %v2829_v56  ;;  %v2926_v56 = vld [vmem:[#allocation2 + $0x324] ss:$8 sps:$4 sm:$0xff]  }
 0x110   :  { %1047 = vmatpush1.bf16.msra.mxu0 %v2824_v57  ;;  %v2915_v57 = vld [vmem:[#allocation2 + $0x210] ss:$8 sps:$4 sm:$0xff]  }
 0x111   :  { %1090 = vmatpush1.bf16.msra.mxu1 %v2827_v58  ;;  %1048 = vmatprep.subr.bf16.mxu0 %v2832_v59  ;;  %v2923_v58 = vld [vmem:[#allocation2 + $0x204] ss:$8 sps:$4 sm:$0xff]   ;;  %v2924_v59 = vld [vmem:[#allocation2 + $0x320] ss:$8 sps:$4 sm:$0xff]  }
 0x112   :  { %1091 = vmatprep.subr.bf16.mxu1 %v2835_v60  ;;  %v2932_v60 = vld [vmem:[#allocation2 + $0x314] ss:$8 sps:$4 sm:$0xff]  }
 0x114   :  { %1049 = vmatpush1.bf16.msra.mxu0 %v2830_v61  ;;  %v2921_v61 = vld [vmem:[#allocation2 + $0x200] ss:$8 sps:$4 sm:$0xff]  }
 0x115   :  { %1092 = vmatpush1.bf16.msra.mxu1 %v2833_v62  ;;  %1050 = vmatprep.subr.bf16.mxu0 %v2838_v63  ;;  %v2929_v62 = vld [vmem:[#allocation2 + $0x2f4] ss:$8 sps:$4 sm:$0xff]   ;;  %v2930_v63 = vld [vmem:[#allocation2 + $0x310] ss:$8 sps:$4 sm:$0xff]  }
 0x116   :  { %1093 = vmatprep.subr.bf16.mxu1 %v2841_v1  ;;  %v2938_v1 = vld [vmem:[#allocation2 + $0x304] ss:$8 sps:$4 sm:$0xff]  }
 0x118   :  { %1051 = vmatpush2.bf16.msra.mxu0 %v2836_v2  ;;  %v2927_v2 = vld [vmem:[#allocation2 + $0x2f0] ss:$8 sps:$4 sm:$0xff]  }
 0x119   :  { %1094 = vmatpush2.bf16.msra.mxu1 %v2839_v3  ;;  %1052 = vmatprep.subr.bf16.mxu0 %v2844_v5  ;;  %v2935_v3 = vld [vmem:[#allocation2 + $0x2e4] ss:$8 sps:$4 sm:$0xff]   ;;  %v2936_v5 = vld [vmem:[#allocation2 + $0x300] ss:$8 sps:$4 sm:$0xff]  }
 0x11a   :  { %1095 = vmatprep.subr.bf16.mxu1 %v2847_v6  ;;  %v2944_v6 = vld [vmem:[#allocation2 + $0x3f4] ss:$8 sps:$4 sm:$0xff]  }
 0x11c   :  { %1053 = vmatpush2.bf16.msra.mxu0 %v2842_v7  ;;  %v2933_v7 = vld [vmem:[#allocation2 + $0x2e0] ss:$8 sps:$4 sm:$0xff]  }
 0x11d   :  { %1096 = vmatpush2.bf16.msra.mxu1 %v2845_v10  ;;  %1054 = vmatprep.subr.bf16.mxu0 %v2850_v11  ;;  %v2941_v10 = vld [vmem:[#allocation2 + $0x2d4] ss:$8 sps:$4 sm:$0xff]   ;;  %v2942_v11 = vld [vmem:[#allocation2 + $0x3f0] ss:$8 sps:$4 sm:$0xff]  }
 0x11e   :  { %1097 = vmatprep.subr.bf16.mxu1 %v2853_v13  ;;  %v2950_v13 = vld [vmem:[#allocation2 + $0x3e4] ss:$8 sps:$4 sm:$0xff]  }
 0x120   :  { %1055 = vmatpush2.bf16.msra.mxu0 %v2848_v14  ;;  %v2939_v14 = vld [vmem:[#allocation2 + $0x2d0] ss:$8 sps:$4 sm:$0xff]  }
 0x121   :  { %1098 = vmatpush2.bf16.msra.mxu1 %v2851_v15  ;;  %1056 = vmatprep.subr.bf16.mxu0 %v2856_v16  ;;  %v2947_v15 = vld [vmem:[#allocation2 + $0x2c4] ss:$8 sps:$4 sm:$0xff]   ;;  %v2948_v16 = vld [vmem:[#allocation2 + $0x3e0] ss:$8 sps:$4 sm:$0xff]  }
 0x122   :  { %1099 = vmatprep.subr.bf16.mxu1 %v2859_v17  ;;  %v2945_v17 = vld [vmem:[#allocation2 + $0x2c0] ss:$8 sps:$4 sm:$0xff]  }
 0x124   :  { %1057 = vmatpush2.bf16.msra.mxu0 %v2854_v18  ;;  %v2953_v18 = vld [vmem:[#allocation2 + $0x2b4] ss:$8 sps:$4 sm:$0xff]  }
 0x125   :  { %1100 = vmatpush2.bf16.msra.mxu1 %v2857_v19  ;;  %1058 = vmatprep.subr.bf16.mxu0 %v2862_v20  ;;  %v2956_v19 = vld [vmem:[#allocation2 + $0x3d4] ss:$8 sps:$4 sm:$0xff]   ;;  %v2951_v20 = vld [vmem:[#allocation2 + $0x2b0] ss:$8 sps:$4 sm:$0xff]  }
 0x126   :  { %1101 = vmatprep.subr.bf16.mxu1 %v2865_v21  ;;  %v2954_v21 = vld [vmem:[#allocation2 + $0x3d0] ss:$8 sps:$4 sm:$0xff]  }
 0x128   :  { %1059 = vmatpush2.bf16.msra.mxu0 %v2860_v22  ;;  %v2959_v22 = vld [vmem:[#allocation2 + $0x2a4] ss:$8 sps:$4 sm:$0xff]  }
 0x129   :  { %1102 = vmatpush2.bf16.msra.mxu1 %v2863_v23  ;;  %1060 = vmatprep.subr.bf16.mxu0 %v2868_v24  ;;  %v2962_v23 = vld [vmem:[#allocation2 + $0x3c4] ss:$8 sps:$4 sm:$0xff]   ;;  %v2957_v24 = vld [vmem:[#allocation2 + $0x2a0] ss:$8 sps:$4 sm:$0xff]  }
 0x12a   :  { %1103 = vmatprep.subr.bf16.mxu1 %v2871_v25  ;;  %v2960_v25 = vld [vmem:[#allocation2 + $0x3c0] ss:$8 sps:$4 sm:$0xff]  }
 0x12c   :  { %1061 = vmatpush2.bf16.msra.mxu0 %v2866_v26  ;;  %v2965_v26 = vld [vmem:[#allocation2 + $0x294] ss:$8 sps:$4 sm:$0xff]  }
 0x12d   :  { %1104 = vmatpush2.bf16.msra.mxu1 %v2869_v27  ;;  %1062 = vmatprep.subr.bf16.mxu0 %v2874_v28  ;;  %v2968_v27 = vld [vmem:[#allocation2 + $0x3b4] ss:$8 sps:$4 sm:$0xff]   ;;  %v2963_v28 = vld [vmem:[#allocation2 + $0x290] ss:$8 sps:$4 sm:$0xff]  }
 0x12e   :  { %1105 = vmatprep.subr.bf16.mxu1 %v2877_v29  ;;  %v2966_v29 = vld [vmem:[#allocation2 + $0x3b0] ss:$8 sps:$4 sm:$0xff]  }
 0x130   :  { %1063 = vmatpush2.bf16.msra.mxu0 %v2872_v30  ;;  %v2971_v30 = vld [vmem:[#allocation2 + $0x284] ss:$8 sps:$4 sm:$0xff]  }
 0x131   :  { %1106 = vmatpush2.bf16.msra.mxu1 %v2875_v31  ;;  %1064 = vmatprep.subr.bf16.mxu0 %v2880_v32  ;;  %v2974_v31 = vld [vmem:[#allocation2 + $0x3a4] ss:$8 sps:$4 sm:$0xff]   ;;  %v2969_v32 = vld [vmem:[#allocation2 + $0x280] ss:$8 sps:$4 sm:$0xff]  }
 0x132   :  { %1107 = vmatprep.subr.bf16.mxu1 %v2883_v33  ;;  %v2972_v33 = vld [vmem:[#allocation2 + $0x3a0] ss:$8 sps:$4 sm:$0xff]  }
 0x134   :  { %1065 = vmatpush2.bf16.msra.mxu0 %v2878_v34  ;;  %v2977_v34 = vld [vmem:[#allocation2 + $0x394] ss:$8 sps:$4 sm:$0xff]  }
 0x135   :  { %1108 = vmatpush2.bf16.msra.mxu1 %v2881_v35  ;;  %1606 = vmatprep.subr.bf16.mxu0 %v2887_v38  ;;  %v2975_v35 = vld [vmem:[#allocation2 + $0x390] ss:$8 sps:$4 sm:$0xff]   ;;  %v2978_v38 = vld [vmem:[#allocation2 + $0x380] ss:$8 sps:$4 sm:$0xff]  }
 0x136   :  { %1145 = vmatprep.subr.bf16.mxu1 %v3165_v4  ;;  %v2890_v4 = vld [vmem:[#allocation2 + $0x264] ss:$8 sps:$4 sm:$0xff]  }
 0x137   :  { %1067 = vmatmul.mubr.bf16.vlgmr.msra.gmra.mxu0 %v3178_v9 }
 0x138   :  { %1110 = vmatmul.mubr.bf16.vlgmr.msra.gmra.mxu1 %v3187_v12  ;;  %1607 = vmatpush1.bf16.msra.mxu0 %v2885_v37  ;;  %v2980_v37 = vld [vmem:[#allocation2 + $0x384] ss:$8 sps:$4 sm:$0xff]  }
 0x139   :  { %1146 = vmatpush1.bf16.msra.mxu1 %v3178_v9  ;;  %1163 = vmatprep.mubr.bf16.mxu1 %v3099_v0  ;;  %v2896_v9 = vld [vmem:[#allocation2 + $0x374] ss:$8 sps:$4 sm:$0xff]  }
 0x13a   :  { %1188 = vmatprep.subr.bf16.mxu1 %v3176_v8  ;;  %1608 = vmatprep.subr.bf16.mxu0 %v2890_v4  ;;  %v2893_v8 = vld [vmem:[#allocation2 + $0x254] ss:$8 sps:$4 sm:$0xff]  }
 0x13b   :  { %v2981_v4 = vld [vmem:[%s3588_s5 + $0x78] sm:$0xff]  }
 0x13c   :  { %1609 = vmatpush1.bf16.msra.mxu0 %v2888_v39 }
 0x13d   :  { %1610 = vmatprep.subr.bf16.mxu0 %v2893_v8 }
 0x140   :  { %2470 = vmatmul.mubr.msk.bf16.vlgmr.msra.gmra.mxu1 %vm150_vm0, %v3400_v36  ;;  %1611 = vmatpush1.bf16.msra.mxu0 %v2891_v42 }
 0x141   :  { %1189 = vmatpush1.bf16.msra.mxu1 %v3187_v12  ;;  %1206 = vmatprep.mubr.bf16.mxu1 %v3099_v0  ;;  %v2900_v12 = vld [vmem:[#allocation2 + $0x360] ss:$8 sps:$4 sm:$0xff]  }
 0x142   :  { %1649 = vmatprep.subr.bf16.mxu1 %v2896_v9  ;;  %1612 = vmatprep.subr.bf16.mxu0 %v2899_v43 }
 0x144   :  { %1613 = vmatpush1.bf16.msra.mxu0 %v2897_v45 }
 0x145   :  { %1614 = vmatprep.subr.bf16.mxu0 %v2905_v46 }
 0x148   :  { %2471 = vmatmul.mubr.msk.bf16.vlgmr.msra.gmra.mxu1 %vm150_vm0, %v3400_v36  ;;  %1615 = vmatpush1.bf16.msra.mxu0 %v2903_v49 }
 0x149   :  { %1650 = vmatpush1.bf16.msra.mxu1 %v2894_v40  ;;  %1616 = vmatprep.subr.bf16.mxu0 %v2911_v50 }
 0x14a   :  { %1651 = vmatprep.subr.bf16.mxu1 %v2902_v41 }
 0x14c   :  { %1617 = vmatpush1.bf16.msra.mxu0 %v2909_v53 }
 0x14d   :  { %1652 = vmatpush1.bf16.msra.mxu1 %v2900_v12  ;;  %1618 = vmatprep.subr.bf16.mxu0 %v2917_v54 }
 0x14e   :  { %1653 = vmatprep.subr.bf16.mxu1 %v2908_v44 }
 0x150   :  { %1619 = vmatpush1.bf16.msra.mxu0 %v2915_v57 }
 0x151   :  { %1654 = vmatpush1.bf16.msra.mxu1 %v2906_v47  ;;  %1620 = vmatprep.subr.bf16.mxu0 %v2923_v58 }
 0x152   :  { %1655 = vmatprep.subr.bf16.mxu1 %v2914_v48 }
 0x154   :  { %1621 = vmatpush1.bf16.msra.mxu0 %v2921_v61 }
 0x155   :  { %1656 = vmatpush1.bf16.msra.mxu1 %v2912_v51  ;;  %1622 = vmatprep.subr.bf16.mxu0 %v2929_v62 }
 0x156   :  { %1657 = vmatprep.subr.bf16.mxu1 %v2920_v52 }
 0x158   :  { %1623 = vmatpush2.bf16.msra.mxu0 %v2927_v2 }
 0x159   :  { %1658 = vmatpush1.bf16.msra.mxu1 %v2918_v55  ;;  %1624 = vmatprep.subr.bf16.mxu0 %v2935_v3 }
 0x15a   :  { %1659 = vmatprep.subr.bf16.mxu1 %v2926_v56 }
 0x15c   :  { %1625 = vmatpush2.bf16.msra.mxu0 %v2933_v7  ;;  %v2982_v7 = vld [vmem:[%s3588_s5 + $0x38] sm:$0xff]  }
 0x15d   :  { %1660 = vmatpush1.bf16.msra.mxu1 %v2924_v59  ;;  %1626 = vmatprep.subr.bf16.mxu0 %v2941_v10 }
 0x15e   :  { %1661 = vmatprep.subr.bf16.mxu1 %v2932_v60 }
 0x160   :  { %1627 = vmatpush2.bf16.msra.mxu0 %v2939_v14 }
 0x161   :  { %1662 = vmatpush1.bf16.msra.mxu1 %v2930_v63  ;;  %1628 = vmatprep.subr.bf16.mxu0 %v2947_v15  ;;  %v2984_v15 = vld [vmem:[%s3588_s5 + $0x30] sm:$0xff]  }
 0x162   :  { %1663 = vmatprep.subr.bf16.mxu1 %v2938_v1 }
 0x164   :  { %1629 = vmatpush2.bf16.msra.mxu0 %v2945_v17 }
 0x165   :  { %1664 = vmatpush1.bf16.msra.mxu1 %v2936_v5  ;;  %1630 = vmatprep.subr.bf16.mxu0 %v2953_v18 }
 0x166   :  { %1665 = vmatprep.subr.bf16.mxu1 %v2944_v6 }
 0x168   :  { %1631 = vmatpush2.bf16.msra.mxu0 %v2951_v20  ;;  %v2985_v20 = vld [vmem:[%s3588_s5 + $0x68] sm:$0xff]  }
 0x169   :  { %1666 = vmatpush2.bf16.msra.mxu1 %v2942_v11  ;;  %1632 = vmatprep.subr.bf16.mxu0 %v2959_v22  ;;  %v2987_v22 = vld [vmem:[%s3588_s5 + $0x60] sm:$0xff]  }
 0x16a   :  { %1667 = vmatprep.subr.bf16.mxu1 %v2950_v13  ;;  %v2983_v13 = vld [vmem:[%s3588_s5 + $0x70] sm:$0xff]  }
 0x16c   :  { %1633 = vmatpush2.bf16.msra.mxu0 %v2957_v24  ;;  %v2989_v24 = vld [vmem:[%s3588_s5 + $0x58] sm:$0xff]  }
 0x16d   :  { %1668 = vmatpush2.bf16.msra.mxu1 %v2948_v16  ;;  %1634 = vmatprep.subr.bf16.mxu0 %v2965_v26  ;;  %v2991_v26 = vld [vmem:[%s3588_s5 + $0x50] sm:$0xff]  }
 0x16e   :  { %1669 = vmatprep.subr.bf16.mxu1 %v2956_v19 }
 0x170   :  { %1635 = vmatpush2.bf16.msra.mxu0 %v2963_v28  ;;  %v2993_v28 = vld [vmem:[%s3588_s5 + $0x48] sm:$0xff]  }
 0x171   :  { %1670 = vmatpush2.bf16.msra.mxu1 %v2954_v21  ;;  %1636 = vmatprep.subr.bf16.mxu0 %v2971_v30  ;;  %v2986_v21 = vld [vmem:[%s3588_s5 + $0x28] sm:$0xff]   ;;  %v2995_v30 = vld [vmem:[%s3588_s5 + $0x40] sm:$0xff]  }
 0x172   :  { %1671 = vmatprep.subr.bf16.mxu1 %v2962_v23  ;;  %v2988_v23 = vld [vmem:[%s3588_s5 + $0x20] sm:$0xff]  }
 0x174   :  { %1637 = vmatpush2.bf16.msra.mxu0 %v2969_v32  ;;  %v1698_v32 = vlaneseq }
 0x175   :  { %1672 = vmatpush2.bf16.msra.mxu1 %v2960_v25  ;;  %2641 = vmatprep.subr.bf16.mxu0 %v2981_v4  ;;  %v2990_v25 = vld [vmem:[%s3588_s5 + $0x18] sm:$0xff]   ;;  %v1696_v4 = vld [vmem:[#allocation4] sm:$0x3] }
 0x176   :  { %1673 = vmatprep.subr.bf16.mxu1 %v2968_v27  ;;  %v2992_v27 = vld [vmem:[%s3588_s5 + $0x10] sm:$0xff]  }
 0x179   :  { %1674 = vmatpush2.bf16.msra.mxu1 %v2966_v29  ;;  %v2994_v29 = vld [vmem:[%s3588_s5 + $0x8] sm:$0xff]  }
 0x17a   :  { %1675 = vmatprep.subr.bf16.mxu1 %v2974_v31  ;;  %v2996_v31 = vld [vmem:[%s3588_s5] sm:$0xff]  }
 0x17d   :  { %1676 = vmatpush2.bf16.msra.mxu1 %v2972_v33 }
 0x17e   :  { %1677 = vmatprep.subr.bf16.mxu1 %v2977_v34  ;;  %v1699_v34 = vshrl.u32 %v1698_v32, 7 }
 0x181   :  { %1678 = vmatpush2.bf16.msra.mxu1 %v2975_v35 }
 0x182   :  { %1679 = vmatprep.subr.bf16.mxu1 %v2980_v37  ;;  %v1700_v37 = vsub.s32 0, %v1699_v34 }
 0x185   :  { %1680 = vmatpush2.bf16.msra.mxu1 %v2978_v38 }
 0x1b7   :  { %v662_v9 = vpop.f32.mrf.mxu0 }
 0x1b8   :  { %v705_v39 = vpop.f32.mrf.mxu1 }
 0x1b9   :  { %v664_v8 = vpop.f32.mrf.mxu0  ;;  %v706_v12 = vadd.f32 %v705_v39, %v662_v9  ;;  %v1704_v39 = vsub.s32 1, %v1699_v34  ;;  %v3021_v34 = vld [vmem:[%s3589_s6 + $0xd8] sm:$0xff]  }
 0x1ba   :  { %v707_v40 = vpop.f32.mrf.mxu1 }
 0x1bb   :  { %v666_v41 = vpop.f32.mrf.mxu0  ;;  %v708_v46 = vadd.f32 %v707_v40, %v664_v8 }
 0x1bc   :  { %v709_v42 = vpop.f32.mrf.mxu1 }
 0x1bd   :  { %v668_v43 = vpop.f32.mrf.mxu0  ;;  %v710_v50 = vadd.f32 %v709_v42, %v666_v41  ;;  %v1701_v42 = vrot.slane %v1696_v4, %v1700_v37  ;;  %v3023_v37 = vld [vmem:[%s3589_s6 + $0xd0] sm:$0xff]  }
 0x1be   :  { %v711_v44 = vpop.f32.mrf.mxu1 }
 0x1bf   :  { %v712_v55 = vadd.f32 %v711_v44, %v668_v43 }
 0x1f7   :  { %v1068_v45 = vpop.f32.mrf.mxu0 }
 0x1f8   :  { %v1069_v47 = vadd.f32 %v1068_v45, %v706_v12  ;;  %v1111_v48 = vpop.f32.mrf.mxu1  ;;  %v1705_v45 = vrot.slane %v1696_v4, %v1704_v39  ;;  %v3027_v4 = vld [vmem:[%s3589_s6 + $0xc0] sm:$0xff]  }
 0x1f9   :  { %v1070_v49 = vpop.f32.mrf.mxu0 }
 0x1fa   :  { %v3411_v51 = vadd.f32 %v1111_v48, %v1069_v47  ;;  %v1071_v52 = vadd.f32 %v1070_v49, %v708_v46  ;;  %v1113_v53 = vpop.f32.mrf.mxu1 }
 0x1fb   :  { %v1072_v54 = vpop.f32.mrf.mxu0 }
 0x1fc   :  { %v3413_v56 = vadd.f32 %v1113_v53, %v1071_v52  ;;  %v1073_v57 = vadd.f32 %v1072_v54, %v710_v50  ;;  %v1115_v58 = vpop.f32.mrf.mxu1 }
 0x1fd   :  { %v1074_v59 = vpop.f32.mrf.mxu0 }
 0x1fe   :  { %v3415_v60 = vadd.f32 %v1115_v58, %v1073_v57  ;;  %v1075_v61 = vadd.f32 %v1074_v59, %v712_v55  ;;  %v1117_v62 = vpop.f32.mrf.mxu1 }
 0x200   :  { %v3417_v63 = vadd.f32 %v1117_v62, %v1075_v61  ;;  %v1165_v1 = vpop.f32.mrf.mxu1 }
 0x202   :  { %v1167_v2 = vpop.f32.mrf.mxu1 }
 0x204   :  { %v1169_v3 = vpop.f32.mrf.mxu1 }
 0x205   :  { %v1217_v10 = vpack.c.bf16 %v1169_v3, %v1165_v1  ;;  %v2997_v1 = vld [vmem:[%s3589_s6 + $0x78] sm:$0xff]   ;;  %v3000_v3 = vld [vmem:[%s3589_s6 + $0x30] sm:$0xff]  }
 0x206   :  { %v1171_v5 = vpop.f32.mrf.mxu1 }
 0x207   :  { %v1218_v6 = vpack.c.bf16 %v1171_v5, %v1167_v2  ;;  %v3029_v2 = vld [vmem:[%s3583_s0] sm:$0xff]   ;;  %v3001_v5 = vld [vmem:[%s3589_s6 + $0x68] sm:$0xff]  }
 0x208   :  { %v1208_v11 = vpop.f32.mrf.mxu1 }
 0x209   :  { %1638 = vmatprep.mubr.bf16.mxu0 %v1218_v6  ;;  %v3002_v6 = vld [vmem:[%s3589_s6 + $0x28] sm:$0xff]  }
 0x20a   :  { %v1210_v14 = vpop.f32.mrf.mxu1  ;;  %1639 = vmatmul.mubr.bf16.vlgmr.msra.gmra.mxu0 %v1217_v10  ;;  %v3004_v10 = vld [vmem:[%s3589_s6 + $0x20] sm:$0xff]  }
 0x20b   :  { %2642 = vmatpush3.bf16.msra.mxu0 %v2982_v7  ;;  %v3003_v7 = vld [vmem:[%s3589_s6 + $0x60] sm:$0xff]  }
 0x20c   :  { %v1212_v16 = vpop.f32.mrf.mxu1  ;;  %2643 = vmatprep.subr.bf16.mxu0 %v2983_v13  ;;  %v3006_v13 = vld [vmem:[%s3589_s6 + $0x18] sm:$0xff]  }
 0x20d   :  { %v1219_v19 = vpack.c.bf16 %v1212_v16, %v1208_v11  ;;  %v3005_v11 = vld [vmem:[%s3589_s6 + $0x58] sm:$0xff]   ;;  %v3009_v16 = vld [vmem:[%s3589_s6 + $0x48] sm:$0xff]  }
 0x20e   :  { %v1214_v17 = vpop.f32.mrf.mxu1 }
 0x20f   :  { %v1220_v18 = vpack.c.bf16 %v1214_v17, %v1210_v14  ;;  %2644 = vmatpush3.bf16.msra.mxu0 %v2984_v15  ;;  %v3007_v14 = vld [vmem:[%s3589_s6 + $0x50] sm:$0xff]   ;;  %v3010_v17 = vld [vmem:[%s3589_s6 + $0x8] sm:$0xff]  }
 0x210   :  { %2645 = vmatprep.subr.bf16.mxu0 %v2985_v20  ;;  %v3008_v15 = vld [vmem:[%s3589_s6 + $0x10] sm:$0xff]   ;;  %v3013_v20 = vld [vmem:[%s3589_s6 + $0xf8] sm:$0xff]  }
 0x211   :  { %1681 = vmatprep.mubr.bf16.mxu1 %v1220_v18  ;;  %v3011_v18 = vld [vmem:[%s3589_s6 + $0x40] sm:$0xff]  }
 0x212   :  { %1682 = vmatmul.mubr.bf16.vlgmr.msra.gmra.mxu1 %v1219_v19  ;;  %v3012_v19 = vld [vmem:[%s3589_s6] sm:$0xff]  }
 0x213   :  { %1782 = vmatprep.mubr.bf16.mxu1 %v3099_v0  ;;  %2646 = vmatpush3.bf16.msra.mxu0 %v2986_v21  ;;  %v3014_v21 = vld [vmem:[%s3589_s6 + $0xb8] sm:$0xff]  }
 0x214   :  { %2647 = vmatprep.subr.bf16.mxu0 %v2987_v22  ;;  %v3015_v22 = vld [vmem:[%s3589_s6 + $0xf0] sm:$0xff]  }
 0x217   :  { %2648 = vmatpush3.bf16.msra.mxu0 %v2988_v23  ;;  %v3016_v23 = vld [vmem:[%s3589_s6 + $0xb0] sm:$0xff]  }
 0x218   :  { %2649 = vmatprep.subr.bf16.mxu0 %v2989_v24  ;;  %v3017_v24 = vld [vmem:[%s3589_s6 + $0xe8] sm:$0xff]  }
 0x21b   :  { %2650 = vmatpush3.bf16.msra.mxu0 %v2990_v25  ;;  %v3018_v25 = vld [vmem:[%s3589_s6 + $0xa8] sm:$0xff]  }
 0x21c   :  { %2651 = vmatprep.subr.bf16.mxu0 %v2991_v26  ;;  %v3019_v26 = vld [vmem:[%s3589_s6 + $0xe0] sm:$0xff]  }
 0x21f   :  { %2652 = vmatpush3.bf16.msra.mxu0 %v2992_v27  ;;  %v3020_v27 = vld [vmem:[%s3589_s6 + $0xa0] sm:$0xff]  }
 0x220   :  { %2653 = vmatprep.subr.bf16.mxu0 %v2993_v28 }
 0x223   :  { %2654 = vmatpush3.bf16.msra.mxu0 %v2994_v29 }
 0x224   :  { %2655 = vmatprep.subr.bf16.mxu0 %v2995_v30 }
 0x227   :  { %2656 = vmatpush3.bf16.msra.mxu0 %v2996_v31 }
 0x228   :  { %2663 = vmatprep.subr.bf16.mxu0 %v3013_v20 }
 0x2ca   :  { %v1640_v33 = vpop.f32.mrf.mxu0 }
 0x2cc   :  { %v1642_v35 = vpop.f32.mrf.mxu0 }
 0x2ce   :  { %v1644_v8 = vpop.f32.mrf.mxu0 }
 0x2d0   :  { %v1646_v47 = vpop.f32.mrf.mxu0 }
 0x2d2   :  { %v1683_v38 = vpop.f32.mrf.mxu1 }
 0x2d3   :  { %v1684_v9 = vadd.f32 %v1683_v38, %v1640_v33  ;;  %v3026_v38 = vld [vmem:[%s3589_s6 + $0x88] sm:$0xff]  }
 0x2d4   :  { %v1685_v40 = vpop.f32.mrf.mxu1 }
 0x2d5   :  { %v1692_v41 = vadd.f32 %v1684_v9, %v3411_v51  ;;  %v1686_v43 = vadd.f32 %v1685_v40, %v1642_v35  ;;  %v3022_v35 = vld [vmem:[%s3589_s6 + $0x98] sm:$0xff]   ;;  %v3028_v9 = vld [vmem:[%s3589_s6 + $0x80] sm:$0xff]  }
 0x2d6   :  { %v1687_v12 = vpop.f32.mrf.mxu1 }
 0x2d7   :  { %v1693_v44 = vadd.f32 %v1686_v43, %v3413_v56  ;;  %v1688_v46 = vadd.f32 %v1687_v12, %v1644_v8  ;;  %v1708_v49 = vadd.f32 %v1701_v42, %v1692_v41 }
 0x2d8   :  { %v1689_v48 = vpop.f32.mrf.mxu1 }
 0x2d9   :  { %v1694_v50 = vadd.f32 %v1688_v46, %v3415_v60  ;;  %v1690_v52 = vadd.f32 %v1689_v48, %v1646_v47  ;;  %v1709_v53 = vadd.f32 %v1705_v45, %v1693_v44  ;;  %v1712_v57 = vmax.f32 %v1708_v49, 0.0  ;;  %v2998_v60 = vld [vmem:[%s3589_s6 + $0x38] sm:$0xff]  }
 0x2db   :  { %v1710_v54 = vadd.f32 %v1701_v42, %v1694_v50  ;;  %v1695_v55 = vadd.f32 %v1690_v52, %v3417_v63  ;;  %v1713_v59 = vmax.f32 %v1709_v53, 0.0  ;;  %v2999_v63 = vld [vmem:[%s3589_s6 + $0x70] sm:$0xff]  }
 0x2dd   :  { %v1714_v58 = vmax.f32 %v1710_v54, 0.0  ;;  %v1711_v51 = vadd.f32 %v1705_v45, %v1695_v55 }
 0x2df   :  { %v3469_v61 = vpack.c.bf16 %v1714_v58, %v1712_v57  ;;  %v1715_v62 = vmax.f32 %v1711_v51, 0.0 }
 0x2e1   :  { %v1717_v56 = vpack.c.bf16 %v1715_v62, %v1713_v59  ;;  %v2618_v59 = vld [vmem:[#allocation6] ss:$0 sm:$0xff] }
 0x2e3   :  { %1764 = vmatprep.subr.bf16.mxu1 %v1717_v56  ;;  %2092 = vmatprep.mubr.bf16.mxu0 %v1717_v56 }
 0x2e4   :  { %1765 = vmatpush1.bf16.msra.mxu1 %v3469_v61  ;;  %2093 = vmatmul.mubr.bf16.vlgmr.msra.gmra.mxu0 %v3469_v61 }
 0x2e5   :  { %2619 = vmatprep.subr.bf16.mxu1 %v2997_v1  ;;  %2664 = vmatpush3.bf16.msra.mxu0 %v3014_v21 }
 0x2e6   :  { %2665 = vmatprep.subr.bf16.mxu0 %v3015_v22 }
 0x2e7   :  { %2536 = vmatmul.mubr.msk.bf16.vlgmr.msra.gmra.mxu1 %vm150_vm0, %v3029_v2 }
 0x2e8   :  { %2620 = vmatpush3.bf16.msra.mxu1 %v2998_v60 }
 0x2e9   :  { %2621 = vmatprep.subr.bf16.mxu1 %v2999_v63  ;;  %2666 = vmatpush3.bf16.msra.mxu0 %v3016_v23 }
 0x2ea   :  { %2667 = vmatprep.subr.bf16.mxu0 %v3017_v24 }
 0x2ec   :  { %2622 = vmatpush3.bf16.msra.mxu1 %v3000_v3 }
 0x2ed   :  { %2623 = vmatprep.subr.bf16.mxu1 %v3001_v5  ;;  %2668 = vmatpush3.bf16.msra.mxu0 %v3018_v25 }
 0x2ee   :  { %2669 = vmatprep.subr.bf16.mxu0 %v3019_v26 }
 0x2f0   :  { %2624 = vmatpush3.bf16.msra.mxu1 %v3002_v6 }
 0x2f1   :  { %2625 = vmatprep.subr.bf16.mxu1 %v3003_v7  ;;  %2670 = vmatpush3.bf16.msra.mxu0 %v3020_v27 }
 0x2f2   :  { %2671 = vmatprep.subr.bf16.mxu0 %v3021_v34 }
 0x2f4   :  { %2626 = vmatpush3.bf16.msra.mxu1 %v3004_v10 }
 0x2f5   :  { %2627 = vmatprep.subr.bf16.mxu1 %v3005_v11  ;;  %2672 = vmatpush3.bf16.msra.mxu0 %v3022_v35 }
 0x2f6   :  { %2673 = vmatprep.subr.bf16.mxu0 %v3023_v37 }
 0x2f8   :  { %2628 = vmatpush3.bf16.msra.mxu1 %v3006_v13 }
 0x2f9   :  { %2629 = vmatprep.subr.bf16.mxu1 %v3007_v14 }
 0x2fc   :  { %2630 = vmatpush3.bf16.msra.mxu1 %v3008_v15 }
 0x2fd   :  { %2631 = vmatprep.subr.bf16.mxu1 %v3009_v16 }
 0x300   :  { %2632 = vmatpush3.bf16.msra.mxu1 %v3010_v17 }
 0x301   :  { %2633 = vmatprep.subr.bf16.mxu1 %v3011_v18 }
 0x304   :  { %2634 = vmatpush3.bf16.msra.mxu1 %v3012_v19 }
 0x305   :  { %2115 = vmatprep.subr.bf16.mxu1 %v1717_v56 }
 0x3a4   :  { %v2657_v49 = vpop.f32.mrf.mxu0 }
 0x3a6   :  { %v2658_v50 = vpop.f32.mrf.mxu0 }
 0x3a7   :  { %v1784_v28 = vpop.f32.mrf.mxu1  ;;  %v2659_v55 = vadd.f32 %v2658_v50, %v2657_v49 }
 0x3a8   :  { %v2660_v52 = vpop.f32.mrf.mxu0 }
 0x3a9   :  { %v1786_v29 = vpop.f32.mrf.mxu1 }
 0x3aa   :  { %v2661_v53 = vpop.f32.mrf.mxu0 }
 0x3ab   :  { %v1788_v30 = vpop.f32.mrf.mxu1  ;;  %v2662_v62 = vadd.f32 %v2661_v53, %v2660_v52 }
 0x3ac   :  { %v1793_v33 = vpack.c.bf16 %v1788_v30, %v1784_v28 }
 0x3ad   :  { %v1790_v31 = vpop.f32.mrf.mxu1 }
 0x3ae   :  { %v1794_v32 = vpack.c.bf16 %v1790_v31, %v1786_v29 }
 0x3b0   :  { %1955 = vmatprep.mubr.bf16.mxu1 %v1794_v32 }
 0x3b1   :  { %1956 = vmatmul.mubr.bf16.vlgmr.msra.gmra.mxu1 %v1793_v33 }
 0x3b2   :  { %2116 = vmatpush1.bf16.msra.mxu1 %v3469_v61  ;;  %2133 = vmatprep.mubr.bf16.mxu1 %v3099_v0  ;;  %v3024_v0 = vld [vmem:[%s3589_s6 + $0x90] sm:$0xff]  }
 0x3b3   :  { %2674 = vmatpush3.bf16.msra.mxu0 %v3024_v0 }
 0x3b9   :  { %2569 = vmatmul.mubr.msk.bf16.vlgmr.msra.gmra.mxu1 %vm150_vm0, %v3400_v36  ;;  %v3025_v36 = vld [vmem:[%s3589_s6 + $0xc8] sm:$0xff]  }
 0x3ba   :  { %2675 = vmatprep.subr.bf16.mxu0 %v3025_v36 }
 0x3bb   :  { %2676 = vmatpush3.bf16.msra.mxu0 %v3026_v38 }
 0x3bc   :  { %2677 = vmatprep.subr.bf16.mxu0 %v3027_v4 }
 0x3bf   :  { %2678 = vmatpush3.bf16.msra.mxu0 %v3028_v9 }
 0x471   :  { %v2635_v39 = vpop.f32.mrf.mxu1 }
 0x473   :  { %v2636_v8 = vpop.f32.mrf.mxu1 }
 0x474   :  { %v2637_v40 = vadd.f32 %v2636_v8, %v2635_v39 }
 0x475   :  { %v2638_v41 = vpop.f32.mrf.mxu1 }
 0x476   :  { %v2095_v58 = vadd.f32 %v2659_v55, %v2637_v40 }
 0x477   :  { %v2639_v42 = vpop.f32.mrf.mxu1 }
 0x478   :  { %v2640_v43 = vadd.f32 %v2639_v42, %v2638_v41 }
 0x479   :  { %v2135_v12 = vpop.f32.mrf.mxu1 }
 0x47a   :  { %v2098_v60 = vadd.f32 %v2662_v62, %v2640_v43 }
 0x47b   :  { %v2137_v44 = vpop.f32.mrf.mxu1 }
 0x47d   :  { %v2139_v45 = vpop.f32.mrf.mxu1 }
 0x47e   :  { %v2144_v48 = vpack.c.bf16 %v2139_v45, %v2135_v12 }
 0x47f   :  { %v2141_v46 = vpop.f32.mrf.mxu1 }
 0x480   :  { %v2145_v47 = vpack.c.bf16 %v2141_v46, %v2137_v44 }
 0x482   :  { %2307 = vmatprep.mubr.bf16.mxu0 %v2145_v47 }
 0x483   :  { %2308 = vmatmul.mubr.bf16.vlgmr.msra.gmra.mxu0 %v2144_v48 }
 0x543   :  { %v2679_v54 = vpop.f32.mrf.mxu0 }
 0x545   :  { %v2680_v57 = vpop.f32.mrf.mxu0 }
 0x546   :  { %v2681_v51 = vadd.f32 %v2680_v57, %v2679_v54 }
 0x547   :  { %v2682_v61 = vpop.f32.mrf.mxu0 }
 0x548   :  { %v2316_v56 = vadd.f32 %v2681_v51, %v2095_v58 }
 0x549   :  { %v2683_v1 = vpop.f32.mrf.mxu0 }
 0x54a   :  { %v2325_v63 = vadd.f32 %v2618_v59, %v2316_v56  ;;  %v2684_v2 = vadd.f32 %v2683_v1, %v2682_v61 }
 0x54c   :  { %2328 = vst.msk [vmem:[%s3591_s8] sm:$0xff] %vm2327_vm1, %v2325_v63  ;;  %v2317_v3 = vadd.f32 %v2684_v2, %v2098_v60 }
 0x54e   :  { %v2326_v5 = vadd.f32 %v2618_v59, %v2317_v3 }
 0x550   :  { %2329 = vst.msk [vmem:[%s3591_s8 + $0x8] sm:$0xff] %vm2327_vm1, %v2326_v5 }
 0x551   :  { %2334 = vsyncpa [#allocation3], 1 }
 0x552   :  { %2335 = vsyncpa [#allocation5], 1 }

</bundles_post_ra>
